<compile_context>
chip_gen: v7x
topology: tpu7x:2x2x1
jax: 0.10.0
libtpu: 0.0.40
codegen_flags: <defaults>
</compile_context>

<pallas_src>
import functools

import jax
import jax.numpy as jnp
from jax.experimental import pallas as pl
from jax.experimental.pallas import tpu as pltpu


def _row_to_col(row, tn):
    """Relayout a (1, tn) int32 lane-vector into a (tn, 1) sublane-column.

    Uses only sublane-broadcast, 2-D iota, select and a lane reduction
    (all natively supported on Mosaic); processes <=128 rows per chunk so the
    extra VPU/XLU work stays ~0.15 cycles/row.
    """
    pieces = []
    eye_full = None
    for k in range(0, tn, 128):
        w = min(128, tn - k)
        if w == 128:
            if eye_full is None:
                s_ = jax.lax.broadcasted_iota(jnp.int32, (128, 128), 0)
                l_ = jax.lax.broadcasted_iota(jnp.int32, (128, 128), 1)
                eye_full = s_ == l_
            eye = eye_full
        else:
            s_ = jax.lax.broadcasted_iota(jnp.int32, (w, w), 0)
            l_ = jax.lax.broadcasted_iota(jnp.int32, (w, w), 1)
            eye = s_ == l_
        chunk = jnp.broadcast_to(row[:, k:k + w], (w, w))      # sublane bcast
        pieces.append(jnp.sum(jnp.where(eye, chunk, 0), axis=1, keepdims=True))
    return pieces[0] if len(pieces) == 1 else jnp.concatenate(pieces, axis=0)


def _ce_partial_kernel(x_ref, t_ref, o_ref, *, tn, n_total):
    """One grid step: partial sum of per-row cross entropy for a tile of rows.

    x_ref : (tn, C) logits tile (native dtype; LSE math done in f32)
    t_ref : (1, 1, tn) int32 lane-dense targets for this tile
    o_ref : (1, 1, 128) f32 -- this tile's partial CE sum, broadcast over lanes
    """
    i = pl.program_id(0)

    x = x_ref[...]                                          # (tn, C) native dtype
    c = x.shape[1]

    # Lane-dense target row -> (tn, 1) column for the broadcast compare.
    t_row = t_ref[0]                                        # (1, tn) int32
    t_col = _row_to_col(t_row, tn)                          # (tn, 1) int32

    # One-hot gather of the target-class logit on the native dtype (exact:
    # exactly one element survives the select per row).
    col = jax.lax.broadcasted_iota(jnp.int32, (tn, c), 1)
    onehot = col == t_col
    tgt = jnp.sum(jnp.where(onehot, x, jnp.zeros_like(x)),
                  axis=-1, keepdims=True).astype(jnp.float32)   # (tn, 1)

    # Stable log-sum-exp per row: max on native dtype (exact), rest in f32.
    m = jnp.max(x, axis=-1, keepdims=True)                  # (tn, 1) native
    xf = x.astype(jnp.float32)
    mf = m.astype(jnp.float32)
    lse = mf + jnp.log(jnp.sum(jnp.exp(xf - mf), axis=-1, keepdims=True))

    ce = lse - tgt                                          # (tn, 1) per-row CE

    # Mask rows past the true batch size (possibly-partial last tile).
    # Keep this as a select (jnp.where): OOB padding rows may hold NaN/Inf.
    row = jax.lax.broadcasted_iota(jnp.int32, (tn, 1), 0)
    valid = (i * tn + row) < n_total
    ce = jnp.where(valid, ce, 0.0)

    s = jnp.sum(ce)                                         # scalar partial sum
    o_ref[...] = jnp.broadcast_to(s, o_ref.shape)           # lane-dense store


def _pick_tile_rows(n, c, itemsize, max_tile_rows, workset_bytes):
    """Biggest 8-multiple row tile whose working set fits the VMEM budget.

    Working set = 2x double-buffered input tiles (native dtype) plus ~4 live
    (tn, C) f32 temporaries (f32 cast, exp, iota, one-hot select), with the
    class axis padded to the 128-lane VMEM granule.
    """
    c_pad = max(128, ((c + 127) // 128) * 128)
    per_row = 2 * c_pad * itemsize + 4 * c_pad * 4
    rows = max(8, ((workset_bytes // per_row) // 8) * 8)
    rows = min(rows, max_tile_rows)
    if n <= 8:
        return n                              # single block equal to array dims
    return max(8, min(rows, (n // 8) * 8))    # multiple of 8, never > batch


def focal_loss(logits, target, gamma=0.0, eps=1e-7, *,
               max_tile_rows=4096,
               vmem_workset_bytes=28 << 20,
               vmem_limit_bytes=40 << 20):
    """Pallas TPU implementation of FocalLoss.forward.

    `eps` is accepted but unused, matching the reference PyTorch module.
    """
    del eps
    n, c = logits.shape
    itemsize = jnp.dtype(logits.dtype).itemsize

    tn = _pick_tile_rows(n, c, itemsize, max_tile_rows, vmem_workset_bytes)
    num_tiles = pl.cdiv(n, tn)
    n_pad = num_tiles * tn

    # Lane-dense targets: (num_tiles, 1, tn) int32, one (1, 1, tn) block/tile.
    t3 = (jnp.zeros((n_pad,), jnp.int32)
          .at[:n].set(target.astype(jnp.int32))
          .reshape(num_tiles, 1, tn))

    kernel = functools.partial(_ce_partial_kernel, tn=tn, n_total=n)

    partials = pl.pallas_call(
        kernel,
        out_shape=jax.ShapeDtypeStruct((num_tiles, 1, 128), jnp.float32),
        grid_spec=pltpu.PrefetchScalarGridSpec(
            num_scalar_prefetch=0,
            grid=(num_tiles,),
            in_specs=[
                pl.BlockSpec((tn, c), lambda i: (i, 0)),        # logits tile
                pl.BlockSpec((1, 1, tn), lambda i: (i, 0, 0)),  # targets tile
            ],
            out_specs=pl.BlockSpec((1, 1, 128), lambda i: (i, 0, 0)),
        ),
        compiler_params=pltpu.CompilerParams(
            dimension_semantics=("parallel",),      # shards tiles on v7x
            vmem_limit_bytes=vmem_limit_bytes),     # explicit scoped VMEM
    )(logits, t3)

    # ---- tiny finalize in plain JAX -----------------------------------------
    logp = jnp.sum(partials[:, 0, 0]) / n                   # CE, reduction='mean'
    p = jnp.exp(-logp)
    return (1.0 - p) ** gamma * logp                        # focal; mean of scalar


def focal_loss_ref(logits, target, gamma=0.0):
    """Plain-JAX reference matching torch.nn.CrossEntropyLoss + focal transform."""
    logits = logits.astype(jnp.float32)
    logz = jax.nn.logsumexp(logits, axis=-1)
    tgt = jnp.take_along_axis(logits, target[:, None].astype(jnp.int32), axis=-1)[:, 0]
    logp = jnp.mean(logz - tgt)
    p = jnp.exp(-logp)
    return (1.0 - p) ** gamma * logp


if __name__ == "__main__":
    N, C = 16, 128          # small shapes: 16 samples, 128 classes
    GAMMA = 2.0

    key = jax.random.PRNGKey(0)
    k1, k2 = jax.random.split(key)
    logits = jax.random.normal(k1, (N, C), dtype=jnp.float32)
    target = jax.random.randint(k2, (N,), 0, C, dtype=jnp.int32)

    loss = jax.block_until_ready(focal_loss(logits, target, gamma=GAMMA))
    ref = jax.block_until_ready(focal_loss_ref(logits, target, gamma=GAMMA))
    assert jnp.allclose(loss, ref, rtol=1e-5, atol=1e-5), (loss, ref)

    # module's default gamma=0 path (reduces to plain mean CE)
    loss0 = jax.block_until_ready(focal_loss(logits, target, gamma=0.0))
    ref0 = jax.block_until_ready(focal_loss_ref(logits, target, gamma=0.0))
    assert jnp.allclose(loss0, ref0, rtol=1e-5, atol=1e-5), (loss0, ref0)

    # non-divisible batch (exercises cdiv grid + row mask) with bf16 logits
    N2 = 23
    logits2 = jax.random.normal(k1, (N2, C), dtype=jnp.bfloat16)
    target2 = jax.random.randint(k2, (N2,), 0, C, dtype=jnp.int32)
    loss2 = jax.block_until_ready(focal_loss(logits2, target2, gamma=GAMMA))
    ref2 = jax.block_until_ready(focal_loss_ref(logits2, target2, gamma=GAMMA))
    assert jnp.allclose(loss2, ref2, rtol=1e-4, atol=1e-4), (loss2, ref2)

    print("KERNEL_OK")
</pallas_src>

<mosaic_0001>
module attributes {stable_mosaic.version = 11 : i64} {
  func.func @_ce_partial_kernel(%arg0: i32, %arg1: memref<16x128xf32, #tpu.memory_space<vmem>>, %arg2: memref<1x1x16xi32, #tpu.memory_space<vmem>>, %arg3: memref<1x1x128xf32, #tpu.memory_space<vmem>>) attributes {dimension_semantics = [#tpu.dimension_semantics<parallel>], iteration_bounds = array<i64: 1>, scalar_prefetch = 0 : i64, scratch_operands = 0 : i64, tpu.core_type = #tpu.core_type<tc>, window_params = [{transform_indices = @transform_0, window_bounds = array<i64: 16, 128>}, {transform_indices = @transform_1, window_bounds = array<i64: 1, 1, 16>}, {transform_indices = @transform_2, window_bounds = array<i64: 1, 1, 128>}]} {
    %c0 = arith.constant 0 : index
    %c0_0 = arith.constant 0 : index
    %0 = vector.load %arg1[%c0, %c0_0] : memref<16x128xf32, #tpu.memory_space<vmem>>, vector<16x128xf32>
    %c0_1 = arith.constant 0 : index
    %c0_2 = arith.constant 0 : index
    %c0_3 = arith.constant 0 : index
    %1 = vector.load %arg2[%c0_1, %c0_2, %c0_3] : memref<1x1x16xi32, #tpu.memory_space<vmem>>, vector<1x1x16xi32>
    %2 = vector.shape_cast %1 : vector<1x1x16xi32> to vector<1x16xi32>
    %3 = tpu.iota {dimensions = array<i32: 0>} : vector<16x16xi32>
    %4 = tpu.iota {dimensions = array<i32: 1>} : vector<16x16xi32>
    %5 = arith.cmpi eq, %3, %4 : vector<16x16xi32>
    %6 = vector.shape_cast %2 : vector<1x16xi32> to vector<1x16xi32>
    %7 = vector.broadcast %6 : vector<1x16xi32> to vector<16x16xi32>
    %c0_i32 = arith.constant 0 : i32
    %8 = vector.broadcast %c0_i32 : i32 to vector<16x16xi32>
    %9 = arith.select %5, %7, %8 : vector<16x16xi1>, vector<16x16xi32>
    %cst = arith.constant dense<0> : vector<16xi32>
    %10 = vector.multi_reduction <add>, %9, %cst [1] : vector<16x16xi32> to vector<16xi32>
    %11 = vector.shape_cast %10 : vector<16xi32> to vector<16x1xi32>
    %12 = tpu.iota {dimensions = array<i32: 1>} : vector<16x128xi32>
    %13 = vector.broadcast %11 : vector<16x1xi32> to vector<16x128xi32>
    %14 = arith.cmpi eq, %12, %13 : vector<16x128xi32>
    %cst_4 = arith.constant 0.000000e+00 : f32
    %15 = vector.broadcast %cst_4 : f32 to vector<16x128xf32>
    %16 = arith.select %14, %0, %15 : vector<16x128xi1>, vector<16x128xf32>
    %cst_5 = arith.constant dense<0.000000e+00> : vector<16xf32>
    %17 = vector.multi_reduction <add>, %16, %cst_5 [1] : vector<16x128xf32> to vector<16xf32>
    %18 = vector.shape_cast %17 : vector<16xf32> to vector<16x1xf32>
    %cst_6 = arith.constant dense<0xFF800000> : vector<16xf32>
    %19 = vector.multi_reduction <maximumf>, %0, %cst_6 [1] : vector<16x128xf32> to vector<16xf32>
    %20 = vector.shape_cast %19 : vector<16xf32> to vector<16x1xf32>
    %21 = vector.broadcast %20 : vector<16x1xf32> to vector<16x128xf32>
    %22 = arith.subf %0, %21 : vector<16x128xf32>
    %23 = math.exp %22 : vector<16x128xf32>
    %cst_7 = arith.constant dense<0.000000e+00> : vector<16xf32>
    %24 = vector.multi_reduction <add>, %23, %cst_7 [1] : vector<16x128xf32> to vector<16xf32>
    %25 = vector.shape_cast %24 : vector<16xf32> to vector<16x1xf32>
    %26 = math.log %25 : vector<16x1xf32>
    %27 = arith.addf %20, %26 : vector<16x1xf32>
    %28 = arith.subf %27, %18 : vector<16x1xf32>
    %29 = tpu.iota {dimensions = array<i32: 0>} : vector<16x1xi32>
    %c16_i32 = arith.constant 16 : i32
    %30 = arith.muli %arg0, %c16_i32 : i32
    %31 = vector.broadcast %30 : i32 to vector<16x1xi32>
    %32 = arith.addi %31, %29 : vector<16x1xi32>
    %c16_i32_8 = arith.constant 16 : i32
    %33 = vector.broadcast %c16_i32_8 : i32 to vector<16x1xi32>
    %34 = arith.cmpi slt, %32, %33 : vector<16x1xi32>
    %cst_9 = arith.constant 0.000000e+00 : f32
    %35 = vector.broadcast %cst_9 : f32 to vector<16x1xf32>
    %36 = arith.select %34, %28, %35 : vector<16x1xi1>, vector<16x1xf32>
    %37 = vector.shape_cast %36 : vector<16x1xf32> to vector<1x16x1xf32>
    %cst_10 = arith.constant dense<0.000000e+00> : vector<1xf32>
    %38 = vector.multi_reduction <add>, %37, %cst_10 [1, 2] : vector<1x16x1xf32> to vector<1xf32>
    %39 = vector.shape_cast %38 : vector<1xf32> to vector<1x1x1xf32>
    %40 = vector.extract %39[0, 0, 0] : f32 from vector<1x1x1xf32>
    %41 = vector.broadcast %40 : f32 to vector<1x1x128xf32>
    %c0_11 = arith.constant 0 : index
    %c0_12 = arith.constant 0 : index
    %c0_13 = arith.constant 0 : index
    %42 = vector.load %arg3[%c0_11, %c0_12, %c0_13] : memref<1x1x128xf32, #tpu.memory_space<vmem>>, vector<1x1x128xf32>
    tpu.vector_store %arg3[%c0_11, %c0_12, %c0_13], %41 {strides = array<i32>} : memref<1x1x128xf32, #tpu.memory_space<vmem>>, vector<1x1x128xf32>,
    return
  }
  func.func @transform_0(%arg0: i32) -> (i32, i32) {
    %c0_i32 = arith.constant 0 : i32
    %c0_i32_0 = arith.constant 0 : i32
    return %arg0, %c0_i32 : i32, i32
  }
  func.func @transform_1(%arg0: i32) -> (i32, i32, i32) {
    %c0_i32 = arith.constant 0 : i32
    %c0_i32_0 = arith.constant 0 : i32
    %c0_i32_1 = arith.constant 0 : i32
    return %arg0, %c0_i32, %c0_i32_0 : i32, i32, i32
  }
  func.func @transform_2(%arg0: i32) -> (i32, i32, i32) {
    %c0_i32 = arith.constant 0 : i32
    %c0_i32_0 = arith.constant 0 : i32
    %c0_i32_1 = arith.constant 0 : i32
    return %arg0, %c0_i32, %c0_i32_0 : i32, i32, i32
  }
}

</mosaic_0001>

<bundles_post_ra>
// kernel: tpu_custom_call.1
= control target key start
LH: loop header
LB: loop body
LE: loop exit
PB: predicated region body
PF: predicated region fallthrough
CT: control target
= control target key end

     0   :  { %7 = vsyncpa [#allocation3], 0  ;;  %s246_s0 = inlined_call_operand.hbm [shape: f32[16,128], index: 0, kind: input, shape index: {}]   ;;  %s247_s1 = inlined_call_operand.vmem [shape: s32[1,1,16], index: 1, kind: input, shape index: {}]   ;;  %s248_s2 = inlined_call_operand.hbm [shape: f32[1,1,128], index: 2, kind: output, shape index: {}]  }
   0x1   :  { %8 = vsyncpa [#allocation4], 0  ;;  %s200_s9 = smov [#allocation2]   ;;  %s152_s13 = scalar_lea.hbm %s246_s0, 256 }
   0x2   :  { %s14_s10 = sshll.u32 %s200_s9, 4  ;;  %p153_p0 = scmp.ne.s32.totalorder %s246_s0, %s152_s13  ;;  %s15_s10 = int_to_ptr.vmem [resolvable:$true] %s14_s10 }
   0x3   :  { %p156_p1 = scmp.lt.u32.totalorder %s152_s13, %s246_s0 }
   0x5   :  { %p158_p2 = pnand %p156_p1, %p153_p0 }
   0x7   :  { %161 = shalt.err (!%p158_p2)
}
   0x8   :  { %s162_s18 = scalar_lea.vmem %s15_s10, 256  ;;  %p167_p4 = scmp.lt.s32.totalorder %s15_s10, %s15_s10 }
   0x9   :  { %p163_p3 = scmp.ne.s32.totalorder %s15_s10, %s162_s18  ;;  %p168_p5 = scmp.lt.s32.totalorder %s162_s18, %s162_s18 }
   0xb   :  { %p169_p6 = por %p168_p5, %p167_p4 }
   0xd   :  { %p170_p7 = pnand %p169_p6, %p163_p3 }
   0xf   :  { %173 = shalt.err (!%p170_p7)
}
  0x10   :  { %s201_s19 = smov 128   ;;  %s202_s20 = smov 8  }
  0x11   :  { %20 = dma.hbm_to_vmem [thread:$0]  %s246_s0, 256, %s15_s10, [#allocation3], %s201_s19, %s201_s19, %s202_s20  }
  0x12   :  { %196 = dma.done.wait [#allocation3], 256  }
  0x13   :  { %197 = vsyncadd [#allocation3], 4294967040  ;;  %v29_v0 = vlaneseq  ;;  %vm42_vm1 = vcmask 130048   ;;  %v26_v4 = vld [vmem:[#allocation2] sm:$0xff]  ;;  %v27_v8 = vld [vmem:[#allocation2 + $0x8] sm:$0xff]  ;;  %vm107_vm5 = vcmask 7168  }
  0x14   :  { %v137_v5 = vld [vmem:[%s247_s1] ss:$0 sm:$0xff]  ;;  %77 = vmax.xlane.f32.xlu0 %v26_v4  ;;  %s203_s0 = smov [#allocation5]  }
  0x15   :  { %v30_v1 = vshrl.u32 %v29_v0, 7  ;;  %v33_v2 = vand.u32 127, %v29_v0  ;;  %s128_s1 = sshll.u32 %s203_s0, 4  ;;  %s129_s1 = int_to_ptr.vmem [resolvable:$true] %s128_s1 }
  0x16   :  { %s174_s26 = scalar_lea.vmem %s129_s1, 16  ;;  %s178_s27 = scalar_lea.vmem %s129_s1, 32 }
  0x17   :  { %v31_v3 = vadd.s32 8, %v30_v1  ;;  %vm34_vm0 = vcmp.eq.s32.totalorder %v30_v1, %v33_v2  ;;  %p175_p8 = scmp.ne.s32.totalorder %s129_s1, %s174_s26  ;;  %p179_p9 = scmp.lt.s32.totalorder %s129_s1, %s129_s1 }
  0x18   :  { %v40_v6 = vsel %vm34_vm0, %v137_v5, 0  ;;  %79 = vmax.xlane.f32.xlu0 %v27_v8  ;;  %p180_p10 = scmp.lt.s32.totalorder %s178_s27, %s174_s26 }
  0x19   :  { %vm35_vm2 = vcmp.eq.s32.totalorder %v31_v3, %v33_v2  ;;  %v43_v9 = vsel %vm42_vm1, %v40_v6, 0 }
  0x1a   :  { %v41_v7 = vsel %vm35_vm2, %v137_v5, 0  ;;  %v45_v11 = vshrl.u32 %v43_v9, 16  ;;  %v44_v13 = vand.u32 65535, %v43_v9  ;;  %p181_p11 = por %p180_p10, %p179_p9 }
  0x1b   :  { %v56_v10 = vsel %vm42_vm1, %v41_v7, 0 }
  0x1c   :  { %v58_v12 = vshrl.u32 %v56_v10, 16  ;;  %v47_v14 = vcvt.s32.f32 %v45_v11  ;;  %v46_v15 = vcvt.s32.f32 %v44_v13  ;;  %v57_v17 = vand.u32 65535, %v56_v10  ;;  %p182_p12 = pnand %p181_p11, %p175_p8 }
  0x1e   :  { %50 = vadd.xlane.f32.xlu1 %v47_v14  ;;  %v60_v16 = vcvt.s32.f32 %v58_v12  ;;  %48 = vadd.xlane.f32.xlu0 %v46_v15  ;;  %v59_v18 = vcvt.s32.f32 %v57_v17 }
  0x22   :  { %63 = vadd.xlane.f32.xlu1 %v60_v16 }
  0x26   :  { %61 = vadd.xlane.f32.xlu1 %v59_v18 }
  0xa1   :  { %v78_v19 = vpop.xlane.xlu0 %77 }
  0xa2   :  { %v81_v20 = vsub.f32 %v26_v4, %v78_v19 }
  0xa4   :  { %v83_v21 = vmul.f32 1.442695, %v81_v20 }
  0xa5   :  { %v80_v22 = vpop.xlane.xlu0 %79 }
  0xa6   :  { %144 = vpow2.f32 %v83_v21  ;;  %v82_v23 = vsub.f32 %v27_v8, %v80_v22 }
  0xa8   :  { %v85_v25 = vmul.f32 1.442695, %v82_v23 }
  0xaa   :  { %146 = vpow2.f32 %v85_v25 }
  0xab   :  { %v51_v24 = vpop.xlane.xlu1 %50  ;;  %v49_v27 = vpop.xlane.xlu0 %48 }
  0xac   :  { %v53_v26 = vcvt.f32.s32 %v51_v24  ;;  %v52_v29 = vcvt.f32.s32 %v49_v27 }
  0xae   :  { %v54_v28 = vshll.u32 %v53_v26, 16 }
  0xaf   :  { %v64_v30 = vpop.xlane.xlu1 %63 }
  0xb0   :  { %v66_v31 = vcvt.f32.s32 %v64_v30  ;;  %v55_v32 = vadd.s32 %v54_v28, %v52_v29  ;;  %v145_v35 = vpop.eup %144 }
  0xb1   :  { %87 = vadd.xlane.f32.xlu0 %v145_v35 }
  0xb2   :  { %v67_v33 = vshll.u32 %v66_v31, 16  ;;  %vm69_vm3 = vcmp.eq.s32.totalorder %v33_v2, %v55_v32 }
  0xb3   :  { %v62_v34 = vpop.xlane.xlu1 %61  ;;  %v71_v38 = vsel %vm69_vm3, %v26_v4, 0.0 }
  0xb4   :  { %v65_v36 = vcvt.f32.s32 %v62_v34  ;;  %v147_v39 = vpop.eup %146 }
  0xb5   :  { %89 = vadd.xlane.f32.xlu1 %v147_v39  ;;  %73 = vadd.xlane.f32.xlu0 %v71_v38 }
  0xb6   :  { %v68_v37 = vadd.s32 %v67_v33, %v65_v36 }
  0xb8   :  { %vm70_vm4 = vcmp.eq.s32.totalorder %v33_v2, %v68_v37 }
  0xb9   :  { %v72_v40 = vsel %vm70_vm4, %v27_v8, 0.0 }
  0xba   :  { %75 = vadd.xlane.f32.xlu1 %v72_v40 }
 0x13e   :  { %v88_v41 = vpop.xlane.xlu0 %87 }
 0x13f   :  { %148 = vlog2.f32 %v88_v41 }
 0x142   :  { %v90_v42 = vpop.xlane.xlu1 %89  ;;  %v74_v48 = vpop.xlane.xlu0 %73 }
 0x143   :  { %150 = vlog2.f32 %v90_v42 }
 0x147   :  { %v76_v51 = vpop.xlane.xlu1 %75 }
 0x149   :  { %v149_v43 = vpop.eup %148 }
 0x14a   :  { %v92_v44 = vmul.f32 0.6931472, %v149_v43 }
 0x14c   :  { %v95_v45 = vadd.f32 %v92_v44, %v78_v19 }
 0x14d   :  { %v151_v46 = vpop.eup %150 }
 0x14e   :  { %v94_v47 = vmul.f32 0.6931472, %v151_v46  ;;  %v97_v49 = vsub.f32 %v95_v45, %v74_v48 }
 0x150   :  { %v96_v50 = vadd.f32 %v94_v47, %v80_v22  ;;  %v108_v53 = vsel %vm107_vm5, %v97_v49, 0.0 }
 0x152   :  { %v98_v52 = vsub.f32 %v96_v50, %v76_v51 }
 0x154   :  { %v109_v54 = vsel %vm107_vm5, %v98_v52, 0.0 }
 0x155   :  { %v110_v55 = vadd.f32 %v109_v54, %v108_v53 }
 0x157   :  { %111 = vadd.xlane.f32.xlu0 %v110_v55 }
 0x1e4   :  { %v112_v56 = vpop.xlane.xlu0 %111 }
 0x1e5   :  { %v113_v57 = vrot.slane %v112_v56, 4 }
 0x1e7   :  { %v114_v58 = vadd.f32 %v113_v57, %v112_v56 }
 0x1e9   :  { %v115_v59 = vrot.slane %v114_v58, 2 }
 0x1eb   :  { %v116_v60 = vadd.f32 %v115_v59, %v114_v58 }
 0x1ed   :  { %v117_v61 = vrot.slane %v116_v60, 1 }
 0x1ef   :  { %v118_v62 = vadd.f32 %v117_v61, %v116_v60 }
 0x1f1   :  { %138 = vpush %v118_v62 }
 0x222   :  { %s139_s25 = spop %138 }
 0x223   :  { %v120_v63 = vstv %s139_s25 }
 0x224   :  { %121 = vst [vmem:[#allocation5] sm:$0x1] %v120_v63 }
 0x225   :  { %185 = shalt.err (!%p182_p12)
}
 0x226   :  { %s186_s30 = scalar_lea.hbm %s248_s2, 16 }
 0x227   :  { %p187_p13 = scmp.ne.s32.totalorder %s248_s2, %s186_s30  ;;  %p190_p0 = scmp.lt.u32.totalorder %s186_s30, %s248_s2 }
 0x229   :  { %p192_p1 = pnand %p190_p0, %p187_p13 }
 0x22b   :  { %195 = shalt.err (!%p192_p1)
}
 0x22c   :  { %131 = dma.vmem_to_hbm [thread:$0]  %s129_s1, 16, %s248_s2, [#allocation4]  }
 0x22d   :  { %198 = dma.done.wait [#allocation4], 16  }
 0x22e   :  { %199 = vsyncadd [#allocation4], 4294967280 }
 0x22f   :  { %135 = vsyncpa [#allocation3], 1 }
 0x230   :  { %136 = vsyncpa [#allocation4], 1 }

</bundles_post_ra>
